<compile_context>
chip_gen: v6e
topology: v6e:2x2x1
jax: 0.10.0
libtpu: 0.0.40
codegen_flags: <defaults>
</compile_context>

<pallas_src>
import jax
import jax.numpy as jnp
from jax.experimental import pallas as pl
from jax.experimental.pallas import tpu as pltpu

D_IN, H1, H2, D_OUT = 784, 256, 128, 10


def _round_up(n, m):
    return ((n + m - 1) // m) * m


def mlp_kernel(x_ref, w1_ref, b1_ref, w2_ref, b2_ref, w3_ref, b3_ref, o_ref):
    # Cast the x tile to bf16 on-chip (VPU, hidden under the tile DMA) so the
    # MXU runs bf16 passes; accumulation and all element-wise work (bias add,
    # ReLU, softmax) stay in f32.
    x = x_ref[...].astype(jnp.bfloat16)                       # (block_b, 784)

    # Layer 1: Linear(784->256) + ReLU   (Dropout = identity in eval mode)
    h = jnp.dot(x, w1_ref[...], preferred_element_type=jnp.float32)
    h = jnp.maximum(h + b1_ref[...], 0.0)

    # Layer 2: Linear(256->128) + ReLU   (Dropout = identity in eval mode)
    h = jnp.dot(h.astype(jnp.bfloat16), w2_ref[...],
                preferred_element_type=jnp.float32)
    h = jnp.maximum(h + b2_ref[...], 0.0)

    # Layer 3: Linear(128->10)
    logits = jnp.dot(h.astype(jnp.bfloat16), w3_ref[...],
                     preferred_element_type=jnp.float32) + b3_ref[...]

    # Softmax over dim=1 (classes); reciprocal on the EUP slot, not VALU div.
    m = jnp.max(logits, axis=1, keepdims=True)
    e = jnp.exp(logits - m)
    inv = pl.reciprocal(jnp.sum(e, axis=1, keepdims=True), approx=True)
    o_ref[...] = (e * inv).astype(o_ref.dtype)


def mlp_simple(x, params, *, block_b=512):
    """Fused MLPSimple forward. x: [B, 784]. Returns [B, 10] float32."""
    B = x.shape[0]
    w1, b1, w2, b2, w3, b3 = params

    # Sublane-aligned batch tile; shrink for tiny batches instead of padding
    # all the way up to the default tile.
    block_b = max(8, min(block_b, _round_up(B, 8)))
    block_b = _round_up(block_b, 8)
    Bp = _round_up(B, block_b)
    grid = (Bp // block_b,)

    bf16 = jnp.bfloat16
    # Row-pad only when the batch is not a tile multiple; x itself is passed
    # through in its native dtype (the bf16 cast happens inside the kernel,
    # avoiding an extra full HBM read+write of x outside the kernel).
    xp = x if Bp == B else jnp.zeros((Bp, D_IN), x.dtype).at[:B].set(x)

    # Weights as bf16 MXU operands (tiny one-time cast, folded by XLA when the
    # params are static); biases broadcast as f32 rows.
    w1b, w2b, w3b = (w.astype(bf16) for w in (w1, w2, w3))
    b1f = b1.astype(jnp.float32).reshape(1, H1)
    b2f = b2.astype(jnp.float32).reshape(1, H2)
    b3f = b3.astype(jnp.float32).reshape(1, D_OUT)

    cost = pl.CostEstimate(
        flops=2 * Bp * (D_IN * H1 + H1 * H2 + H2 * D_OUT),
        transcendentals=Bp * (D_OUT + 1),          # exp per class + 1/sum per row
        bytes_accessed=(Bp * D_IN * xp.dtype.itemsize          # x in
                        + Bp * D_OUT * 4                       # probs out
                        + (D_IN * H1 + H1 * H2 + H2 * D_OUT) * 2   # bf16 weights
                        + (H1 + H2 + D_OUT) * 4),              # f32 biases
    )

    out = pl.pallas_call(
        mlp_kernel,
        out_shape=jax.ShapeDtypeStruct((Bp, D_OUT), jnp.float32),
        grid_spec=pltpu.PrefetchScalarGridSpec(
            num_scalar_prefetch=0,
            grid=grid,
            in_specs=[
                # x tile: the only per-step HBM traffic; pipelined across the grid.
                pl.BlockSpec((block_b, D_IN), lambda i: (i, 0)),
                # Weights / biases use constant index_maps -> fetched once and
                # kept VMEM-resident (~0.5 MiB total at bf16).
                pl.BlockSpec((D_IN, H1),  lambda i: (0, 0)),   # W1
                pl.BlockSpec((1, H1),     lambda i: (0, 0)),   # b1
                pl.BlockSpec((H1, H2),    lambda i: (0, 0)),   # W2
                pl.BlockSpec((1, H2),     lambda i: (0, 0)),   # b2
                pl.BlockSpec((H2, D_OUT), lambda i: (0, 0)),   # W3
                pl.BlockSpec((1, D_OUT),  lambda i: (0, 0)),   # b3
            ],
            out_specs=pl.BlockSpec((block_b, D_OUT), lambda i: (i, 0)),
        ),
        compiler_params=pltpu.CompilerParams(
            # Batch-tile axis is independent -> shards across both TCs on v7x.
            dimension_semantics=("parallel",),
            # Working set (<=~5 MiB at block_b=512) fits on v5e/v6e/v7x.
            vmem_limit_bytes=32 * 1024 * 1024,
        ),
        cost_estimate=cost,
    )(xp, w1b, b1f, w2b, b2f, w3b, b3f)

    return out[:B]


def init_params(key):
    # Deterministic synthetic parameters (PyTorch-Linear-like uniform init).
    ks = jax.random.split(key, 6)

    def lin(kw, kb, fan_in, fan_out):
        bound = 1.0 / jnp.sqrt(fan_in)
        w = jax.random.uniform(kw, (fan_in, fan_out), jnp.float32, -bound, bound)
        b = jax.random.uniform(kb, (1, fan_out), jnp.float32, -bound, bound)
        return w, b

    w1, b1 = lin(ks[0], ks[1], D_IN, H1)
    w2, b2 = lin(ks[2], ks[3], H1, H2)
    w3, b3 = lin(ks[4], ks[5], H2, D_OUT)
    return (w1, b1, w2, b2, w3, b3)


def mlp_reference(x, params):
    # Reference with the same bf16 MXU operands / f32 accumulation as the
    # kernel, so the comparison isolates kernel logic from quantization.
    w1, b1, w2, b2, w3, b3 = params
    bf16 = jnp.bfloat16
    h = jnp.dot(x.astype(bf16), w1.astype(bf16),
                preferred_element_type=jnp.float32) + b1
    h = jnp.maximum(h, 0.0)
    h = jnp.dot(h.astype(bf16), w2.astype(bf16),
                preferred_element_type=jnp.float32) + b2
    h = jnp.maximum(h, 0.0)
    logits = jnp.dot(h.astype(bf16), w3.astype(bf16),
                     preferred_element_type=jnp.float32) + b3
    return jax.nn.softmax(logits, axis=1)


if __name__ == "__main__":
    key = jax.random.PRNGKey(0)
    k_x, k_p = jax.random.split(key)

    params = init_params(k_p)

    # Small demo batch (single tile path, no padding).
    B = 8
    x = jax.random.normal(k_x, (B, D_IN), jnp.float32)
    out = jax.block_until_ready(mlp_simple(x, params))
    ref = mlp_reference(x, params)
    assert out.shape == (B, D_OUT)
    assert jnp.allclose(out, ref, atol=1e-2, rtol=1e-2)
    assert jnp.allclose(jnp.sum(out, axis=1), jnp.ones((B,)), atol=1e-2)

    # Exercise the tiled / row-padded path (grid > 1, batch not a tile multiple).
    B2 = 300
    x2 = jax.random.normal(k_x, (B2, D_IN), jnp.float32)
    out2 = jax.block_until_ready(mlp_simple(x2, params, block_b=128))
    ref2 = mlp_reference(x2, params)
    assert out2.shape == (B2, D_OUT)
    assert jnp.allclose(out2, ref2, atol=1e-2, rtol=1e-2)
    assert jnp.allclose(jnp.sum(out2, axis=1), jnp.ones((B2,)), atol=1e-2)

    print("KERNEL_OK")
</pallas_src>

<mosaic_0001>
module attributes {stable_mosaic.version = 11 : i64} {
  func.func @mlp_kernel(%arg0: i32, %arg1: memref<8x784xf32, #tpu.memory_space<vmem>>, %arg2: memref<784x256xbf16, #tpu.memory_space<vmem>>, %arg3: memref<1x256xf32, #tpu.memory_space<vmem>>, %arg4: memref<256x128xbf16, #tpu.memory_space<vmem>>, %arg5: memref<1x128xf32, #tpu.memory_space<vmem>>, %arg6: memref<128x10xbf16, #tpu.memory_space<vmem>>, %arg7: memref<1x10xf32, #tpu.memory_space<vmem>>, %arg8: memref<8x10xf32, #tpu.memory_space<vmem>>) attributes {dimension_semantics = [#tpu.dimension_semantics<parallel>], iteration_bounds = array<i64: 1>, scalar_prefetch = 0 : i64, scratch_operands = 0 : i64, tpu.core_type = #tpu.core_type<tc>, window_params = [{transform_indices = @transform_0, window_bounds = array<i64: 8, 784>}, {pipeline_mode = #tpu.pipeline_mode<synchronous>, transform_indices = @transform_1, window_bounds = array<i64: 784, 256>}, {pipeline_mode = #tpu.pipeline_mode<synchronous>, transform_indices = @transform_2, window_bounds = array<i64: 1, 256>}, {pipeline_mode = #tpu.pipeline_mode<synchronous>, transform_indices = @transform_3, window_bounds = array<i64: 256, 128>}, {pipeline_mode = #tpu.pipeline_mode<synchronous>, transform_indices = @transform_4, window_bounds = array<i64: 1, 128>}, {pipeline_mode = #tpu.pipeline_mode<synchronous>, transform_indices = @transform_5, window_bounds = array<i64: 128, 10>}, {pipeline_mode = #tpu.pipeline_mode<synchronous>, transform_indices = @transform_6, window_bounds = array<i64: 1, 10>}, {transform_indices = @transform_7, window_bounds = array<i64: 8, 10>}]} {
    %c0 = arith.constant 0 : index
    %c0_0 = arith.constant 0 : index
    %0 = vector.load %arg1[%c0, %c0_0] : memref<8x784xf32, #tpu.memory_space<vmem>>, vector<8x784xf32>
    %1 = arith.truncf %0 : vector<8x784xf32> to vector<8x784xbf16>
    %c0_1 = arith.constant 0 : index
    %c0_2 = arith.constant 0 : index
    %2 = vector.load %arg2[%c0_1, %c0_2] : memref<784x256xbf16, #tpu.memory_space<vmem>>, vector<784x256xbf16>
    %cst = arith.constant dense<0.000000e+00> : vector<8x256xf32>
    %3 = tpu.matmul %1, %2, %cst {dimension_numbers = #tpu.dot_dimension_numbers<[1], [0], [0], [1], [0, 0, 1, 1], [], []>} : vector<8x784xbf16>, vector<784x256xbf16>, vector<8x256xf32> -> vector<8x256xf32>
    %c0_3 = arith.constant 0 : index
    %c0_4 = arith.constant 0 : index
    %4 = vector.load %arg3[%c0_3, %c0_4] : memref<1x256xf32, #tpu.memory_space<vmem>>, vector<1x256xf32>
    %5 = vector.broadcast %4 : vector<1x256xf32> to vector<8x256xf32>
    %6 = arith.addf %3, %5 : vector<8x256xf32>
    %cst_5 = arith.constant 0.000000e+00 : f32
    %7 = vector.broadcast %cst_5 : f32 to vector<8x256xf32>
    %8 = arith.maximumf %6, %7 : vector<8x256xf32>
    %9 = arith.truncf %8 : vector<8x256xf32> to vector<8x256xbf16>
    %c0_6 = arith.constant 0 : index
    %c0_7 = arith.constant 0 : index
    %10 = vector.load %arg4[%c0_6, %c0_7] : memref<256x128xbf16, #tpu.memory_space<vmem>>, vector<256x128xbf16>
    %cst_8 = arith.constant dense<0.000000e+00> : vector<8x128xf32>
    %11 = tpu.matmul %9, %10, %cst_8 {dimension_numbers = #tpu.dot_dimension_numbers<[1], [0], [0], [1], [0, 0, 1, 1], [], []>} : vector<8x256xbf16>, vector<256x128xbf16>, vector<8x128xf32> -> vector<8x128xf32>
    %c0_9 = arith.constant 0 : index
    %c0_10 = arith.constant 0 : index
    %12 = vector.load %arg5[%c0_9, %c0_10] : memref<1x128xf32, #tpu.memory_space<vmem>>, vector<1x128xf32>
    %13 = vector.broadcast %12 : vector<1x128xf32> to vector<8x128xf32>
    %14 = arith.addf %11, %13 : vector<8x128xf32>
    %cst_11 = arith.constant 0.000000e+00 : f32
    %15 = vector.broadcast %cst_11 : f32 to vector<8x128xf32>
    %16 = arith.maximumf %14, %15 : vector<8x128xf32>
    %17 = arith.truncf %16 : vector<8x128xf32> to vector<8x128xbf16>
    %c0_12 = arith.constant 0 : index
    %c0_13 = arith.constant 0 : index
    %18 = vector.load %arg6[%c0_12, %c0_13] : memref<128x10xbf16, #tpu.memory_space<vmem>>, vector<128x10xbf16>
    %cst_14 = arith.constant dense<0.000000e+00> : vector<8x10xf32>
    %19 = tpu.matmul %17, %18, %cst_14 {dimension_numbers = #tpu.dot_dimension_numbers<[1], [0], [0], [1], [0, 0, 1, 1], [], []>} : vector<8x128xbf16>, vector<128x10xbf16>, vector<8x10xf32> -> vector<8x10xf32>
    %c0_15 = arith.constant 0 : index
    %c0_16 = arith.constant 0 : index
    %20 = vector.load %arg7[%c0_15, %c0_16] : memref<1x10xf32, #tpu.memory_space<vmem>>, vector<1x10xf32>
    %21 = vector.broadcast %20 : vector<1x10xf32> to vector<8x10xf32>
    %22 = arith.addf %19, %21 : vector<8x10xf32>
    %cst_17 = arith.constant dense<0xFF800000> : vector<8xf32>
    %23 = vector.multi_reduction <maximumf>, %22, %cst_17 [1] : vector<8x10xf32> to vector<8xf32>
    %24 = vector.shape_cast %23 : vector<8xf32> to vector<8x1xf32>
    %25 = vector.broadcast %24 : vector<8x1xf32> to vector<8x10xf32>
    %26 = arith.subf %22, %25 : vector<8x10xf32>
    %27 = math.exp %26 : vector<8x10xf32>
    %cst_18 = arith.constant dense<0.000000e+00> : vector<8xf32>
    %28 = vector.multi_reduction <add>, %27, %cst_18 [1] : vector<8x10xf32> to vector<8xf32>
    %29 = vector.shape_cast %28 : vector<8xf32> to vector<8x1xf32>
    %30 = tpu.reciprocal %29 {approx = true} : vector<8x1xf32> -> vector<8x1xf32>
    %31 = vector.broadcast %30 : vector<8x1xf32> to vector<8x10xf32>
    %32 = arith.mulf %27, %31 : vector<8x10xf32>
    %c0_19 = arith.constant 0 : index
    %c0_20 = arith.constant 0 : index
    %33 = vector.load %arg8[%c0_19, %c0_20] : memref<8x10xf32, #tpu.memory_space<vmem>>, vector<8x10xf32>
    tpu.vector_store %arg8[%c0_19, %c0_20], %32 {strides = array<i32>} : memref<8x10xf32, #tpu.memory_space<vmem>>, vector<8x10xf32>,
    return
  }
  func.func @transform_0(%arg0: i32) -> (i32, i32) {
    %c0_i32 = arith.constant 0 : i32
    %c0_i32_0 = arith.constant 0 : i32
    return %arg0, %c0_i32 : i32, i32
  }
  func.func @transform_1(%arg0: i32) -> (i32, i32) {
    %c0_i32 = arith.constant 0 : i32
    %c0_i32_0 = arith.constant 0 : i32
    %c0_i32_1 = arith.constant 0 : i32
    return %c0_i32, %c0_i32_0 : i32, i32
  }
  func.func @transform_2(%arg0: i32) -> (i32, i32) {
    %c0_i32 = arith.constant 0 : i32
    %c0_i32_0 = arith.constant 0 : i32
    %c0_i32_1 = arith.constant 0 : i32
    return %c0_i32, %c0_i32_0 : i32, i32
  }
  func.func @transform_3(%arg0: i32) -> (i32, i32) {
    %c0_i32 = arith.constant 0 : i32
    %c0_i32_0 = arith.constant 0 : i32
    %c0_i32_1 = arith.constant 0 : i32
    return %c0_i32, %c0_i32_0 : i32, i32
  }
  func.func @transform_4(%arg0: i32) -> (i32, i32) {
    %c0_i32 = arith.constant 0 : i32
    %c0_i32_0 = arith.constant 0 : i32
    %c0_i32_1 = arith.constant 0 : i32
    return %c0_i32, %c0_i32_0 : i32, i32
  }
  func.func @transform_5(%arg0: i32) -> (i32, i32) {
    %c0_i32 = arith.constant 0 : i32
    %c0_i32_0 = arith.constant 0 : i32
    %c0_i32_1 = arith.constant 0 : i32
    return %c0_i32, %c0_i32_0 : i32, i32
  }
  func.func @transform_6(%arg0: i32) -> (i32, i32) {
    %c0_i32 = arith.constant 0 : i32
    %c0_i32_0 = arith.constant 0 : i32
    %c0_i32_1 = arith.constant 0 : i32
    return %c0_i32, %c0_i32_0 : i32, i32
  }
  func.func @transform_7(%arg0: i32) -> (i32, i32) {
    %c0_i32 = arith.constant 0 : i32
    %c0_i32_0 = arith.constant 0 : i32
    return %arg0, %c0_i32 : i32, i32
  }
}

</mosaic_0001>

<bundles_post_ra>
// kernel: tpu_custom_call.1
= control target key start
LH: loop header
LB: loop body
LE: loop exit
PB: predicated region body
PF: predicated region fallthrough
CT: control target
= control target key end

     0   :  { %12 = vsyncpa [#allocation3], 0  ;;  %s1712_s0 = inlined_call_operand.vmem [shape: f32[8,784], index: 0, kind: input, shape index: {}]   ;;  %s1713_s1 = inlined_call_operand.hbm [shape: bf16[784,256], index: 1, kind: input, shape index: {}]   ;;  %s1714_s2 = inlined_call_operand.vmem [shape: f32[1,256], index: 2, kind: input, shape index: {}]   ;;  %s1715_s3 = inlined_call_operand.hbm [shape: bf16[256,128], index: 3, kind: input, shape index: {}]   ;;  %s1716_s4 = inlined_call_operand.vmem [shape: f32[1,128], index: 4, kind: input, shape index: {}]   ;;  %s1717_s5 = inlined_call_operand.vmem [shape: bf16[128,10], index: 5, kind: input, shape index: {}]   ;;  %s1718_s6 = inlined_call_operand.vmem [shape: f32[1,10], index: 6, kind: input, shape index: {}]   ;;  %s1719_s7 = inlined_call_operand.hbm [shape: f32[8,10], index: 7, kind: output, shape index: {}]  }
   0x1   :  { %13 = vsyncpa [#allocation6], 0 }
   0x2   :  { %14 = vsyncpa [#allocation4], 0  ;;  %s1586_s24 = smov [#allocation2]  }
   0x3   :  { %s22_s25 = sshll.u32 %s1586_s24, 4  ;;  %s23_s25 = int_to_ptr.vmem [resolvable:$true] %s22_s25 }
   0x4   :  { %s1528_s26 = scalar_lea.vmem %s23_s25, 12544  ;;  %p1533_p1 = scmp.lt.s32.totalorder %s23_s25, %s23_s25 }
   0x5   :  { %p1529_p0 = scmp.ne.s32.totalorder %s23_s25, %s1528_s26  ;;  %p1534_p2 = scmp.lt.s32.totalorder %s1528_s26, %s1528_s26 }
   0x7   :  { %p1535_p3 = por %p1534_p2, %p1533_p1 }
   0x9   :  { %p1536_p4 = pnand %p1535_p3, %p1529_p0 }
   0xb   :  { %1539 = shalt.err (!%p1536_p4)
}
   0xc   :  { %s1587_s27 = smov 128   ;;  %s1588_s28 = smov 8  }
   0xd   :  { %28 = dma.hbm_to_vmem [thread:$0]  %s1713_s1, 12544, %s23_s25, [#allocation3], %s1587_s27, %s1587_s27, %s1588_s28  }
   0xe   :  { %s1589_s8 = smov [#allocation5]  }
   0xf   :  { %s36_s9 = sshll.u32 %s1589_s8, 4  ;;  %s37_s9 = int_to_ptr.vmem [resolvable:$true] %s36_s9 }
  0x10   :  { %s1548_s10 = scalar_lea.vmem %s37_s9, 2048  ;;  %p1553_p6 = scmp.lt.s32.totalorder %s37_s9, %s37_s9 }
  0x11   :  { %p1549_p5 = scmp.ne.s32.totalorder %s37_s9, %s1548_s10  ;;  %p1554_p7 = scmp.lt.s32.totalorder %s1548_s10, %s1548_s10 }
  0x13   :  { %p1555_p8 = por %p1554_p7, %p1553_p6 }
  0x15   :  { %p1556_p9 = pnand %p1555_p8, %p1549_p5 }
  0x17   :  { %1559 = shalt.err (!%p1556_p9)
}
  0x18   :  { %s1590_s11 = smov 64   ;;  %s1591_s12 = smov 4  }
  0x19   :  { %42 = dma.hbm_to_vmem [thread:$0]  %s1715_s3, 2048, %s37_s9, [#allocation6], %s1590_s11, %s1590_s11, %s1591_s12  }
  0x1a   :  { %1580 = dma.done.wait [#allocation3], 12544  }
  0x1b   :  { %1581 = vsyncadd [#allocation3], 4294954752 }
  0x1c   :  { %1582 = dma.done.wait [#allocation6], 2048  }
  0x1d   :  { %1583 = vsyncadd [#allocation6], 4294965248  ;;  %v1345_v0 = vld [vmem:[#allocation2 + $0x74] ss:$8 sps:$4 sm:$0xff]   ;;  %v1347_v1 = vld [vmem:[#allocation2 + $0x70] ss:$8 sps:$4 sm:$0xff]  }
  0x1e   :  { %674 = vmatprep.subr.bf16.mxu0 %v1345_v0  ;;  %v1348_v2 = vld [vmem:[#allocation2 + $0x174] ss:$8 sps:$4 sm:$0xff]   ;;  %v1350_v3 = vld [vmem:[#allocation2 + $0x170] ss:$8 sps:$4 sm:$0xff]   ;;  %v1351_v4 = vld [vmem:[#allocation2 + $0x64] ss:$8 sps:$4 sm:$0xff]  }
  0x1f   :  { %675 = vmatpush1.bf16.msra.mxu0 %v1347_v1  ;;  %v1353_v5 = vld [vmem:[#allocation2 + $0x60] ss:$8 sps:$4 sm:$0xff]   ;;  %715 = vmatprep.subr.bf16.mxu1 %v1348_v2  ;;  %v1354_v6 = vld [vmem:[#allocation2 + $0x164] ss:$8 sps:$4 sm:$0xff]   ;;  %v1357_v8 = vld [vmem:[#allocation2 + $0x54] ss:$8 sps:$4 sm:$0xff]  }
  0x20   :  { %716 = vmatpush1.bf16.msra.mxu1 %v1350_v3  ;;  %676 = vmatprep.subr.bf16.mxu0 %v1351_v4  ;;  %v1356_v7 = vld [vmem:[#allocation2 + $0x160] ss:$8 sps:$4 sm:$0xff]   ;;  %v1359_v9 = vld [vmem:[#allocation2 + $0x50] ss:$8 sps:$4 sm:$0xff]   ;;  %v1360_v10 = vld [vmem:[#allocation2 + $0x154] ss:$8 sps:$4 sm:$0xff]  }
  0x21   :  { %717 = vmatprep.subr.bf16.mxu1 %v1354_v6  ;;  %v1363_v11 = vld [vmem:[#allocation2 + $0x44] ss:$8 sps:$4 sm:$0xff]   ;;  %v1362_v12 = vld [vmem:[#allocation2 + $0x150] ss:$8 sps:$4 sm:$0xff]   ;;  %v1365_v14 = vld [vmem:[#allocation2 + $0x40] ss:$8 sps:$4 sm:$0xff]  }
  0x22   :  { %v1366_v13 = vld [vmem:[#allocation2 + $0x144] ss:$8 sps:$4 sm:$0xff]   ;;  %v1369_v15 = vld [vmem:[#allocation2 + $0x34] ss:$8 sps:$4 sm:$0xff]   ;;  %v1368_v16 = vld [vmem:[#allocation2 + $0x140] ss:$8 sps:$4 sm:$0xff]  }
  0x23   :  { %677 = vmatpush1.bf16.msra.mxu0 %v1353_v5  ;;  %v1372_v17 = vld [vmem:[#allocation2 + $0x134] ss:$8 sps:$4 sm:$0xff]   ;;  %v1371_v18 = vld [vmem:[#allocation2 + $0x30] ss:$8 sps:$4 sm:$0xff]   ;;  %v1375_v19 = vld [vmem:[#allocation2 + $0x24] ss:$8 sps:$4 sm:$0xff]  }
  0x24   :  { %678 = vmatprep.subr.bf16.mxu0 %v1357_v8  ;;  %718 = vmatpush1.bf16.msra.mxu1 %v1356_v7  ;;  %v1374_v20 = vld [vmem:[#allocation2 + $0x130] ss:$8 sps:$4 sm:$0xff]   ;;  %v1378_v21 = vld [vmem:[#allocation2 + $0x124] ss:$8 sps:$4 sm:$0xff]   ;;  %v1377_v22 = vld [vmem:[#allocation2 + $0x20] ss:$8 sps:$4 sm:$0xff]  }
  0x25   :  { %719 = vmatprep.subr.bf16.mxu1 %v1360_v10  ;;  %v1381_v23 = vld [vmem:[#allocation2 + $0x14] ss:$8 sps:$4 sm:$0xff]   ;;  %v1380_v24 = vld [vmem:[#allocation2 + $0x120] ss:$8 sps:$4 sm:$0xff]   ;;  %v1383_v26 = vld [vmem:[#allocation2 + $0x10] ss:$8 sps:$4 sm:$0xff]  }
  0x26   :  { %v1384_v25 = vld [vmem:[#allocation2 + $0x114] ss:$8 sps:$4 sm:$0xff]   ;;  %v1387_v27 = vld [vmem:[#allocation2 + $0x4] ss:$8 sps:$4 sm:$0xff]   ;;  %v1386_v28 = vld [vmem:[#allocation2 + $0x110] ss:$8 sps:$4 sm:$0xff]  }
  0x27   :  { %679 = vmatpush1.bf16.msra.mxu0 %v1359_v9  ;;  %v1390_v29 = vld [vmem:[#allocation2 + $0x104] ss:$8 sps:$4 sm:$0xff]   ;;  %v1389_v30 = vld [vmem:[#allocation2] ss:$8 sps:$4 sm:$0xff]   ;;  %v1393_v31 = vld [vmem:[#allocation2 + $0xf4] ss:$8 sps:$4 sm:$0xff]  }
  0x28   :  { %680 = vmatprep.subr.bf16.mxu0 %v1363_v11  ;;  %720 = vmatpush1.bf16.msra.mxu1 %v1362_v12  ;;  %v1392_v32 = vld [vmem:[#allocation2 + $0x100] ss:$8 sps:$4 sm:$0xff]   ;;  %v1396_v33 = vld [vmem:[#allocation2 + $0x1f4] ss:$8 sps:$4 sm:$0xff]   ;;  %v1395_v34 = vld [vmem:[#allocation2 + $0xf0] ss:$8 sps:$4 sm:$0xff]  }
  0x29   :  { %721 = vmatprep.subr.bf16.mxu1 %v1366_v13  ;;  %v1399_v35 = vld [vmem:[#allocation2 + $0xe4] ss:$8 sps:$4 sm:$0xff]   ;;  %v1398_v36 = vld [vmem:[#allocation2 + $0x1f0] ss:$8 sps:$4 sm:$0xff]   ;;  %v1401_v38 = vld [vmem:[#allocation2 + $0xe0] ss:$8 sps:$4 sm:$0xff]  }
  0x2a   :  { %v1402_v37 = vld [vmem:[#allocation2 + $0x1e4] ss:$8 sps:$4 sm:$0xff]   ;;  %v1405_v39 = vld [vmem:[#allocation2 + $0xd4] ss:$8 sps:$4 sm:$0xff]   ;;  %v1404_v40 = vld [vmem:[#allocation2 + $0x1e0] ss:$8 sps:$4 sm:$0xff]  }
  0x2b   :  { %681 = vmatpush1.bf16.msra.mxu0 %v1365_v14  ;;  %v1408_v41 = vld [vmem:[#allocation2 + $0x1d4] ss:$8 sps:$4 sm:$0xff]   ;;  %v1407_v42 = vld [vmem:[#allocation2 + $0xd0] ss:$8 sps:$4 sm:$0xff]   ;;  %v1411_v43 = vld [vmem:[#allocation2 + $0xc4] ss:$8 sps:$4 sm:$0xff]  }
  0x2c   :  { %682 = vmatprep.subr.bf16.mxu0 %v1369_v15  ;;  %722 = vmatpush1.bf16.msra.mxu1 %v1368_v16  ;;  %v1410_v44 = vld [vmem:[#allocation2 + $0x1d0] ss:$8 sps:$4 sm:$0xff]   ;;  %v1414_v45 = vld [vmem:[#allocation2 + $0x1c4] ss:$8 sps:$4 sm:$0xff]   ;;  %v1413_v47 = vld [vmem:[#allocation2 + $0xc0] ss:$8 sps:$4 sm:$0xff]  }
  0x2d   :  { %723 = vmatprep.subr.bf16.mxu1 %v1372_v17  ;;  %v57_v46 = vld [vmem:[%s1712_s0 + $0x8] sm:$0xff]  ;;  %v1417_v49 = vld [vmem:[#allocation2 + $0xb4] ss:$8 sps:$4 sm:$0xff]   ;;  %v1419_v54 = vld [vmem:[#allocation2 + $0xb0] ss:$8 sps:$4 sm:$0xff]   ;;  %vm670_vm0 = vcmask 130048  }
  0x2e   :  { %v64_v48 = vpack.c.bf16 %v57_v46, %v57_v46  ;;  %v59_v50 = vld [vmem:[%s1712_s0 + $0x18] sm:$0xff]  ;;  %v1416_v51 = vld [vmem:[#allocation2 + $0x1c0] ss:$8 sps:$4 sm:$0xff]   ;;  %v1423_v55 = vld [vmem:[#allocation2 + $0xa4] ss:$8 sps:$4 sm:$0xff]   ;;  %vm1594_vm1 = vmmov 0  }
  0x2f   :  { %683 = vmatpush1.bf16.msra.mxu0 %v1371_v18  ;;  %v66_v52 = vpack.c.bf16 %v59_v50, %v59_v50  ;;  %v1420_v53 = vld [vmem:[#allocation2 + $0x1b4] ss:$8 sps:$4 sm:$0xff]   ;;  %v1422_v56 = vld [vmem:[#allocation2 + $0x1b0] ss:$8 sps:$4 sm:$0xff]   ;;  %v1426_v57 = vld [vmem:[#allocation2 + $0x1a4] ss:$8 sps:$4 sm:$0xff]  }
  0x30   :  { %684 = vmatprep.subr.bf16.mxu0 %v1375_v19  ;;  %724 = vmatpush1.bf16.msra.mxu1 %v1374_v20  ;;  %v1425_v58 = vld [vmem:[#allocation2 + $0xa0] ss:$8 sps:$4 sm:$0xff]   ;;  %v1429_v59 = vld [vmem:[#allocation2 + $0x94] ss:$8 sps:$4 sm:$0xff]   ;;  %v1431_v62 = vld [vmem:[#allocation2 + $0x90] ss:$8 sps:$4 sm:$0xff]  }
  0x31   :  { %725 = vmatprep.subr.bf16.mxu1 %v1378_v21  ;;  %706 = vmatprep.mubr.bf16.mxu0 %v64_v48  ;;  %v1428_v60 = vld [vmem:[#allocation2 + $0x1a0] ss:$8 sps:$4 sm:$0xff]   ;;  %v1432_v61 = vld [vmem:[#allocation2 + $0x194] ss:$8 sps:$4 sm:$0xff]   ;;  %v1435_v63 = vld [vmem:[#allocation2 + $0x84] ss:$8 sps:$4 sm:$0xff]  }
  0x32   :  { %747 = vmatprep.mubr.bf16.mxu1 %v66_v52  ;;  %v1434_v0 = vld [vmem:[#allocation2 + $0x190] ss:$8 sps:$4 sm:$0xff]   ;;  %v1437_v1 = vld [vmem:[#allocation2 + $0x80] ss:$8 sps:$4 sm:$0xff]   ;;  %v1438_v2 = vld [vmem:[#allocation2 + $0x184] ss:$8 sps:$4 sm:$0xff]  }
  0x33   :  { %685 = vmatpush1.bf16.msra.mxu0 %v1377_v22  ;;  %v1440_v3 = vld [vmem:[#allocation2 + $0x180] ss:$8 sps:$4 sm:$0xff]   ;;  %v1443_v5 = vld [vmem:[#allocation2 + $0x274] ss:$8 sps:$4 sm:$0xff]   ;;  %v1441_v8 = vld [vmem:[#allocation2 + $0x270] ss:$8 sps:$4 sm:$0xff]  }
  0x34   :  { %686 = vmatprep.subr.bf16.mxu0 %v1381_v23  ;;  %726 = vmatpush1.bf16.msra.mxu1 %v1380_v24  ;;  %v56_v4 = vld [vmem:[%s1712_s0] sm:$0xff]  ;;  %v58_v6 = vld [vmem:[%s1712_s0 + $0x10] sm:$0xff]  ;;  %v61_v16 = vld [vmem:[%s1712_s0 + $0x28] sm:$0xff]  ;;  %v1592_v19 = vmov 0   ;;  %vm1130_vm2 = vcmask 80896  }
  0x35   :  { %727 = vmatprep.subr.bf16.mxu1 %v1384_v25  ;;  %v63_v7 = vpack.c.bf16 %v56_v4, %v56_v4  ;;  %v1446_v9 = vld [vmem:[#allocation2 + $0x264] ss:$8 sps:$4 sm:$0xff]   ;;  %v65_v10 = vpack.c.bf16 %v58_v6, %v58_v6  ;;  %v1486_v11 = vld [vmem:[#allocation2 + $0x300] ss:$8 sps:$4 sm:$0xff]   ;;  %v1449_v14 = vld [vmem:[#allocation2 + $0x254] ss:$8 sps:$4 sm:$0xff]   ;;  %v68_v17 = vpack.c.bf16 %v61_v16, %v61_v16 }
  0x36   :  { %v1488_v12 = vld [vmem:[#allocation2 + $0x304] ss:$8 sps:$4 sm:$0xff]   ;;  %v1444_v13 = vld [vmem:[#allocation2 + $0x260] ss:$8 sps:$4 sm:$0xff]   ;;  %v62_v15 = vld [vmem:[%s1712_s0 + $0x30] sm:$0xff] }
  0x37   :  { %687 = vmatpush1.bf16.msra.mxu0 %v1383_v26  ;;  %v1447_v18 = vld [vmem:[#allocation2 + $0x250] ss:$8 sps:$4 sm:$0xff]   ;;  %v1452_v20 = vld [vmem:[#allocation2 + $0x244] ss:$8 sps:$4 sm:$0xff]   ;;  %v69_v21 = vpack.c.bf16 %v62_v15, %v62_v15  ;;  %v1450_v22 = vld [vmem:[#allocation2 + $0x240] ss:$8 sps:$4 sm:$0xff]  }
  0x38   :  { %688 = vmatprep.subr.bf16.mxu0 %v1387_v27  ;;  %728 = vmatpush1.bf16.msra.mxu1 %v1386_v28  ;;  %v1455_v23 = vld [vmem:[#allocation2 + $0x234] ss:$8 sps:$4 sm:$0xff]   ;;  %v1453_v24 = vld [vmem:[#allocation2 + $0x230] ss:$8 sps:$4 sm:$0xff]   ;;  %v1458_v25 = vld [vmem:[#allocation2 + $0x224] ss:$8 sps:$4 sm:$0xff]  }
  0x39   :  { %729 = vmatprep.subr.bf16.mxu1 %v1390_v29  ;;  %v1456_v26 = vld [vmem:[#allocation2 + $0x220] ss:$8 sps:$4 sm:$0xff]   ;;  %v1461_v27 = vld [vmem:[#allocation2 + $0x214] ss:$8 sps:$4 sm:$0xff]   ;;  %v1459_v28 = vld [vmem:[#allocation2 + $0x210] ss:$8 sps:$4 sm:$0xff]  }
  0x3a   :  { %v1464_v29 = vld [vmem:[#allocation2 + $0x204] ss:$8 sps:$4 sm:$0xff]   ;;  %v1489_v46 = vld [vmem:[#allocation2 + $0x280] ss:$8 sps:$4 sm:$0xff]  }
  0x3b   :  { %689 = vmatpush1.bf16.msra.mxu0 %v1389_v30  ;;  %v1462_v30 = vld [vmem:[#allocation2 + $0x200] ss:$8 sps:$4 sm:$0xff]  }
  0x3c   :  { %690 = vmatprep.subr.bf16.mxu0 %v1393_v31  ;;  %730 = vmatpush1.bf16.msra.mxu1 %v1392_v32  ;;  %v1467_v31 = vld [vmem:[#allocation2 + $0x2f4] ss:$8 sps:$4 sm:$0xff]   ;;  %v1465_v32 = vld [vmem:[#allocation2 + $0x2f0] ss:$8 sps:$4 sm:$0xff]   ;;  %v1493_v50 = vld [vmem:[#allocation5 + $0x38] sm:$0xff]  }
  0x3d   :  { %731 = vmatprep.subr.bf16.mxu1 %v1396_v33  ;;  %v1470_v33 = vld [vmem:[#allocation2 + $0x2e4] ss:$8 sps:$4 sm:$0xff]  }
  0x3e   :  { %v1495_v52 = vld [vmem:[#allocation5 + $0x30] sm:$0xff]  }
  0x3f   :  { %691 = vmatpush2.bf16.msra.mxu0 %v1395_v34  ;;  %v1468_v34 = vld [vmem:[#allocation2 + $0x2e0] ss:$8 sps:$4 sm:$0xff]  }
  0x40   :  { %692 = vmatprep.subr.bf16.mxu0 %v1399_v35  ;;  %732 = vmatpush2.bf16.msra.mxu1 %v1398_v36  ;;  %v1473_v35 = vld [vmem:[#allocation2 + $0x2d4] ss:$8 sps:$4 sm:$0xff]   ;;  %v1471_v36 = vld [vmem:[#allocation2 + $0x2d0] ss:$8 sps:$4 sm:$0xff]  }
  0x41   :  { %733 = vmatprep.subr.bf16.mxu1 %v1402_v37  ;;  %v1476_v37 = vld [vmem:[#allocation2 + $0x2c4] ss:$8 sps:$4 sm:$0xff]  }
  0x43   :  { %693 = vmatpush2.bf16.msra.mxu0 %v1401_v38  ;;  %v1474_v38 = vld [vmem:[#allocation2 + $0x2c0] ss:$8 sps:$4 sm:$0xff]  }
  0x44   :  { %694 = vmatprep.subr.bf16.mxu0 %v1405_v39  ;;  %734 = vmatpush2.bf16.msra.mxu1 %v1404_v40  ;;  %v1479_v39 = vld [vmem:[#allocation2 + $0x2b4] ss:$8 sps:$4 sm:$0xff]   ;;  %v1477_v40 = vld [vmem:[#allocation2 + $0x2b0] ss:$8 sps:$4 sm:$0xff]  }
  0x45   :  { %735 = vmatprep.subr.bf16.mxu1 %v1408_v41  ;;  %v1482_v41 = vld [vmem:[#allocation2 + $0x2a4] ss:$8 sps:$4 sm:$0xff]  }
  0x47   :  { %695 = vmatpush2.bf16.msra.mxu0 %v1407_v42  ;;  %v1480_v42 = vld [vmem:[#allocation2 + $0x2a0] ss:$8 sps:$4 sm:$0xff]  }
  0x48   :  { %696 = vmatprep.subr.bf16.mxu0 %v1411_v43  ;;  %736 = vmatpush2.bf16.msra.mxu1 %v1410_v44  ;;  %v1485_v43 = vld [vmem:[#allocation2 + $0x294] ss:$8 sps:$4 sm:$0xff]   ;;  %v1483_v44 = vld [vmem:[#allocation2 + $0x290] ss:$8 sps:$4 sm:$0xff]  }
  0x49   :  { %737 = vmatprep.subr.bf16.mxu1 %v1414_v45  ;;  %v1491_v45 = vld [vmem:[#allocation2 + $0x284] ss:$8 sps:$4 sm:$0xff]  }
  0x4b   :  { %697 = vmatpush2.bf16.msra.mxu0 %v1413_v47  ;;  %v60_v47 = vld [vmem:[%s1712_s0 + $0x20] sm:$0xff] }
  0x4c   :  { %698 = vmatprep.subr.bf16.mxu0 %v1417_v49  ;;  %738 = vmatpush2.bf16.msra.mxu1 %v1416_v51  ;;  %v67_v48 = vpack.c.bf16 %v60_v47, %v60_v47  ;;  %v1492_v49 = vld [vmem:[#allocation5 + $0x78] sm:$0xff]   ;;  %v1494_v51 = vld [vmem:[#allocation5 + $0x70] sm:$0xff]  }
  0x4d   :  { %739 = vmatprep.subr.bf16.mxu1 %v1420_v53  ;;  %v1496_v53 = vld [vmem:[#allocation5 + $0x68] sm:$0xff]  }
  0x4f   :  { %699 = vmatpush2.bf16.msra.mxu0 %v1419_v54  ;;  %v1497_v54 = vld [vmem:[#allocation5 + $0x28] sm:$0xff]  }
  0x50   :  { %700 = vmatprep.subr.bf16.mxu0 %v1423_v55  ;;  %740 = vmatpush2.bf16.msra.mxu1 %v1422_v56  ;;  %v1498_v55 = vld [vmem:[#allocation5 + $0x60] sm:$0xff]  }
  0x51   :  { %741 = vmatprep.subr.bf16.mxu1 %v1426_v57  ;;  %v1499_v56 = vld [vmem:[#allocation5 + $0x20] sm:$0xff]   ;;  %v1500_v57 = vld [vmem:[#allocation5 + $0x58] sm:$0xff]  }
  0x53   :  { %701 = vmatpush2.bf16.msra.mxu0 %v1425_v58  ;;  %v1501_v58 = vld [vmem:[#allocation5 + $0x18] sm:$0xff]  }
  0x54   :  { %702 = vmatprep.subr.bf16.mxu0 %v1429_v59  ;;  %742 = vmatpush2.bf16.msra.mxu1 %v1428_v60  ;;  %v1502_v59 = vld [vmem:[#allocation5 + $0x50] sm:$0xff]  }
  0x55   :  { %743 = vmatprep.subr.bf16.mxu1 %v1432_v61  ;;  %v1503_v60 = vld [vmem:[#allocation5 + $0x10] sm:$0xff]   ;;  %v1504_v61 = vld [vmem:[#allocation5 + $0x48] sm:$0xff]  }
  0x57   :  { %703 = vmatpush2.bf16.msra.mxu0 %v1431_v62  ;;  %v1505_v62 = vld [vmem:[#allocation5 + $0x8] sm:$0xff]  }
  0x58   :  { %704 = vmatprep.subr.bf16.mxu0 %v1435_v63  ;;  %744 = vmatpush2.bf16.msra.mxu1 %v1434_v0  ;;  %v1506_v63 = vld [vmem:[#allocation5 + $0x40] sm:$0xff]  }
  0x59   :  { %745 = vmatprep.subr.bf16.mxu1 %v1438_v2  ;;  %v1507_v0 = vld [vmem:[#allocation5] sm:$0xff]  }
  0x5b   :  { %705 = vmatpush2.bf16.msra.mxu0 %v1437_v1  ;;  %v1593_v1 = vmov 0.0  }
  0x5c   :  { %756 = vmatprep.subr.bf16.mxu0 %v1443_v5  ;;  %746 = vmatpush2.bf16.msra.mxu1 %v1440_v3 }
  0x5d   :  { %811 = vmatprep.subr.bf16.mxu1 %v1488_v12 }
  0x5e   :  { %707 = vmatmul.mubr.bf16.vlgmr.msra.gmra.mxu0 %v63_v7 }
  0x5f   :  { %757 = vmatpush1.bf16.msra.mxu0 %v1441_v8  ;;  %748 = vmatmul.mubr.bf16.vlgmr.msra.gmra.mxu1 %v65_v10 }
  0x60   :  { %758 = vmatprep.subr.bf16.mxu0 %v1446_v9  ;;  %812 = vmatpush1.bf16.msra.mxu1 %v1486_v11 }
  0x61   :  { %829 = vmatprep.mubr.bf16.mxu1 %v1592_v19  ;;  %788 = vmatprep.mubr.bf16.mxu0 %v68_v17  ;;  %v168_v17 = vld [vmem:[%s1714_s2] sm:$0x3] }
  0x62   :  { %1284 = vmatprep.subr.bf16.mxu1 %v1492_v49 }
  0x63   :  { %759 = vmatpush1.bf16.msra.mxu0 %v1444_v13 }
  0x64   :  { %760 = vmatprep.subr.bf16.mxu0 %v1449_v14  ;;  %v170_v14 = vlaneseq }
  0x66   :  { %v171_v15 = vshrl.u32 %v170_v14, 7 }
  0x67   :  { %761 = vmatpush1.bf16.msra.mxu0 %v1447_v18  ;;  %1257 = vmatmul.mubr.msk.bf16.vlgmr.msra.gmra.mxu1 %vm670_vm0, %v69_v21 }
  0x68   :  { %762 = vmatprep.subr.bf16.mxu0 %v1452_v20  ;;  %1285 = vmatpush3.bf16.msra.mxu1 %v1493_v50  ;;  %v172_v16 = vsub.s32 0, %v171_v15  ;;  %v176_v18 = vsub.s32 1, %v171_v15 }
  0x69   :  { %1286 = vmatprep.subr.bf16.mxu1 %v1494_v51 }
  0x6a   :  { %v173_v19 = vrot.slane %v168_v17, %v172_v16  ;;  %v177_v20 = vrot.slane %v168_v17, %v176_v18 }
  0x6b   :  { %763 = vmatpush1.bf16.msra.mxu0 %v1450_v22 }
  0x6c   :  { %764 = vmatprep.subr.bf16.mxu0 %v1455_v23  ;;  %1287 = vmatpush3.bf16.msra.mxu1 %v1495_v52 }
  0x6d   :  { %1288 = vmatprep.subr.bf16.mxu1 %v1496_v53 }
  0x6f   :  { %765 = vmatpush1.bf16.msra.mxu0 %v1453_v24 }
  0x70   :  { %766 = vmatprep.subr.bf16.mxu0 %v1458_v25  ;;  %1289 = vmatpush3.bf16.msra.mxu1 %v1497_v54  ;;  %v1275_v54 = vld [vmem:[%s1718_s6] ss:$0 sm:$0xff] }
  0x71   :  { %1290 = vmatprep.subr.bf16.mxu1 %v1498_v55 }
  0x73   :  { %767 = vmatpush1.bf16.msra.mxu0 %v1456_v26 }
  0x74   :  { %768 = vmatprep.subr.bf16.mxu0 %v1461_v27  ;;  %1291 = vmatpush3.bf16.msra.mxu1 %v1499_v56 }
  0x75   :  { %1292 = vmatprep.subr.bf16.mxu1 %v1500_v57 }
  0x77   :  { %769 = vmatpush1.bf16.msra.mxu0 %v1459_v28 }
  0x78   :  { %770 = vmatprep.subr.bf16.mxu0 %v1464_v29  ;;  %1293 = vmatpush3.bf16.msra.mxu1 %v1501_v58 }
  0x79   :  { %1294 = vmatprep.subr.bf16.mxu1 %v1502_v59 }
  0x7b   :  { %771 = vmatpush1.bf16.msra.mxu0 %v1462_v30 }
  0x7c   :  { %772 = vmatprep.subr.bf16.mxu0 %v1467_v31  ;;  %1295 = vmatpush3.bf16.msra.mxu1 %v1503_v60 }
  0x7d   :  { %1296 = vmatprep.subr.bf16.mxu1 %v1504_v61 }
  0x7f   :  { %773 = vmatpush2.bf16.msra.mxu0 %v1465_v32 }
  0x80   :  { %774 = vmatprep.subr.bf16.mxu0 %v1470_v33  ;;  %1297 = vmatpush3.bf16.msra.mxu1 %v1505_v62 }
  0x81   :  { %1298 = vmatprep.subr.bf16.mxu1 %v1506_v63 }
  0x83   :  { %775 = vmatpush2.bf16.msra.mxu0 %v1468_v34 }
  0x84   :  { %776 = vmatprep.subr.bf16.mxu0 %v1473_v35  ;;  %1299 = vmatpush3.bf16.msra.mxu1 %v1507_v0 }
  0x85   :  { %1315 = vmatprep.subr.bf16.mxu1 %v1593_v1 }
  0x87   :  { %777 = vmatpush2.bf16.msra.mxu0 %v1471_v36  ;;  %v1508_v36 = vld [vmem:[%s1717_s5 + $0x38] sm:$0xff]  }
  0x88   :  { %778 = vmatprep.subr.bf16.mxu0 %v1476_v37 }
  0x8b   :  { %779 = vmatpush2.bf16.msra.mxu0 %v1474_v38  ;;  %v1509_v38 = vld [vmem:[%s1717_s5 + $0x30] sm:$0xff]  }
  0x8c   :  { %780 = vmatprep.subr.bf16.mxu0 %v1479_v39  ;;  %v1510_v39 = vld [vmem:[%s1717_s5 + $0x28] sm:$0xff]  }
  0x8f   :  { %781 = vmatpush2.bf16.msra.mxu0 %v1477_v40  ;;  %v1511_v40 = vld [vmem:[%s1717_s5 + $0x20] sm:$0xff]  }
  0x90   :  { %782 = vmatprep.subr.bf16.mxu0 %v1482_v41  ;;  %v1512_v41 = vld [vmem:[%s1717_s5 + $0x18] sm:$0xff]  }
  0x93   :  { %783 = vmatpush2.bf16.msra.mxu0 %v1480_v42  ;;  %v1513_v42 = vld [vmem:[%s1717_s5 + $0x10] sm:$0xff]  }
  0x94   :  { %784 = vmatprep.subr.bf16.mxu0 %v1485_v43  ;;  %v1514_v43 = vld [vmem:[%s1717_s5 + $0x8] sm:$0xff]  }
  0x97   :  { %785 = vmatpush2.bf16.msra.mxu0 %v1483_v44  ;;  %v1515_v44 = vld [vmem:[%s1717_s5] sm:$0xff]  }
  0x98   :  { %786 = vmatprep.subr.bf16.mxu0 %v1491_v45 }
  0x9b   :  { %787 = vmatpush2.bf16.msra.mxu0 %v1489_v46  ;;  %v1258_v46 = vld [vmem:[%s1716_s4] ss:$0 sm:$0xff]  ;;  %s1595_s4 = smov [#allocation7]  }
  0x9c   :  { %s1149_s5 = sshll.u32 %s1595_s4, 4  ;;  %s1150_s5 = int_to_ptr.vmem [resolvable:$true] %s1149_s5 }
  0x9d   :  { %s1560_s6 = scalar_lea.vmem %s1150_s5, 128  ;;  %p1565_p11 = scmp.lt.s32.totalorder %s1150_s5, %s1150_s5 }
  0x9e   :  { %789 = vmatmul.mubr.bf16.vlgmr.msra.gmra.mxu0 %v67_v48  ;;  %p1561_p10 = scmp.ne.s32.totalorder %s1150_s5, %s1560_s6  ;;  %p1566_p12 = scmp.lt.s32.totalorder %s1560_s6, %s1560_s6 }
  0xa0   :  { %p1567_p13 = por %p1566_p12, %p1565_p11 }
  0xa2   :  { %p1568_p0 = pnand %p1567_p13, %p1561_p10 }
 0x11e   :  { %v708_v2 = vpop.f32.mrf.mxu0 }
 0x11f   :  { %v749_v4 = vpop.f32.mrf.mxu1  ;;  %v709_v21 = vadd.f32 %v708_v2, %v173_v19 }
 0x120   :  { %v710_v3 = vpop.f32.mrf.mxu0 }
 0x121   :  { %v751_v6 = vpop.f32.mrf.mxu1  ;;  %v711_v22 = vadd.f32 %v710_v3, %v177_v20  ;;  %v750_v23 = vadd.f32 %v749_v4, %v709_v21 }
 0x122   :  { %v712_v5 = vpop.f32.mrf.mxu0 }
 0x123   :  { %v753_v8 = vpop.f32.mrf.mxu1  ;;  %v752_v25 = vadd.f32 %v751_v6, %v711_v22 }
 0x124   :  { %v713_v7 = vpop.f32.mrf.mxu0 }
 0x125   :  { %v754_v9 = vpop.f32.mrf.mxu1 }
 0x127   :  { %v831_v10 = vpop.f32.mrf.mxu1 }
 0x129   :  { %v833_v11 = vpop.f32.mrf.mxu1 }
 0x12b   :  { %v835_v12 = vpop.f32.mrf.mxu1 }
 0x12d   :  { %v836_v13 = vpop.f32.mrf.mxu1 }
 0x15e   :  { %v790_v24 = vpop.f32.mrf.mxu0 }
 0x15f   :  { %v791_v26 = vadd.f32 %v790_v24, %v750_v23 }
 0x160   :  { %v792_v27 = vpop.f32.mrf.mxu0 }
 0x161   :  { %v832_v28 = vadd.f32 %v831_v10, %v791_v26  ;;  %v793_v29 = vadd.f32 %v792_v27, %v752_v25 }
 0x162   :  { %v794_v30 = vpop.f32.mrf.mxu0 }
 0x163   :  { %v834_v31 = vadd.f32 %v833_v11, %v793_v29  ;;  %v838_v32 = vmax.f32 %v832_v28, 0.0 }
 0x164   :  { %v795_v33 = vpop.f32.mrf.mxu0 }
 0x165   :  { %v839_v34 = vmax.f32 %v834_v31, 0.0  ;;  %v840_v37 = vpack.c.bf16 %v838_v32, %v838_v32 }
 0x167   :  { %v841_v35 = vpack.c.bf16 %v839_v34, %v839_v34 }
 0x169   :  { %1009 = vmatprep.mubr.bf16.mxu1 %v841_v35 }
 0x16a   :  { %1010 = vmatmul.mubr.bf16.vlgmr.msra.gmra.mxu1 %v840_v37 }
 0x16b   :  { %1316 = vmatpush3.bf16.msra.mxu1 %v1508_v36  ;;  %1331 = vmatprep.mubr.msk.bf16.mxu1 %vm1594_vm1, %v1593_v1 }
 0x16c   :  { %1317 = vmatprep.subr.bf16.mxu1 %v1593_v1 }
 0x16f   :  { %1318 = vmatpush3.bf16.msra.mxu1 %v1509_v38 }
 0x170   :  { %1319 = vmatprep.subr.bf16.mxu1 %v1593_v1 }
 0x173   :  { %1320 = vmatpush3.bf16.msra.mxu1 %v1510_v39 }
 0x174   :  { %1321 = vmatprep.subr.bf16.mxu1 %v1593_v1 }
 0x177   :  { %1322 = vmatpush3.bf16.msra.mxu1 %v1511_v40 }
 0x178   :  { %1323 = vmatprep.subr.bf16.mxu1 %v1593_v1 }
 0x17b   :  { %1324 = vmatpush3.bf16.msra.mxu1 %v1512_v41 }
 0x17c   :  { %1325 = vmatprep.subr.bf16.mxu1 %v1593_v1 }
 0x17f   :  { %1326 = vmatpush3.bf16.msra.mxu1 %v1513_v42 }
 0x180   :  { %1327 = vmatprep.subr.bf16.mxu1 %v1593_v1 }
 0x183   :  { %1328 = vmatpush3.bf16.msra.mxu1 %v1514_v43 }
 0x184   :  { %1329 = vmatprep.subr.bf16.mxu1 %v1593_v1 }
 0x187   :  { %1330 = vmatpush3.bf16.msra.mxu1 %v1515_v44 }
 0x22a   :  { %v1300_v45 = vpop.f32.mrf.mxu1 }
 0x22c   :  { %v1301_v47 = vpop.f32.mrf.mxu1 }
 0x22d   :  { %v1302_v48 = vadd.f32 %v1301_v47, %v1300_v45 }
 0x22e   :  { %v1303_v49 = vpop.f32.mrf.mxu1 }
 0x22f   :  { %v1012_v50 = vadd.f32 %v1302_v48, %v1258_v46 }
 0x230   :  { %v1304_v51 = vpop.f32.mrf.mxu1 }
 0x231   :  { %v1017_v52 = vmax.f32 %v1012_v50, 0.0 }
 0x233   :  { %v1018_v53 = vpack.c.bf16 %v1017_v52, %v1017_v52 }
 0x235   :  { %1332 = vmatmul.mubr.bf16.vlgmr.msra.gmra.mxu1 %v1018_v53 }
 0x2f5   :  { %v1124_v55 = vpop.f32.mrf.mxu1 }
 0x2f6   :  { %v1125_v56 = vadd.f32 %v1275_v54, %v1124_v55 }
 0x2f7   :  { %v1333_v57 = vpop.f32.mrf.mxu1 }
 0x2f8   :  { %v1131_v58 = vsel %vm1130_vm2, %v1125_v56, -inf }
 0x2f9   :  { %1132 = vmax.xlane.f32.xlu0 %v1131_v58  ;;  %v1127_v59 = vpop.f32.mrf.mxu1 }
 0x2fb   :  { %v1334_v60 = vpop.f32.mrf.mxu1 }
 0x382   :  { %v1133_v61 = vpop.xlane.xlu0 %1132 }
 0x383   :  { %v1134_v62 = vsub.f32 %v1125_v56, %v1133_v61 }
 0x385   :  { %v1135_v63 = vmul.f32 1.442695, %v1134_v62 }
 0x387   :  { %1516 = vpow2.f32 %v1135_v63 }
 0x394   :  { %v1517_v0 = vpop.eup %1516 }
 0x395   :  { %v1137_v1 = vsel %vm1130_vm2, %v1517_v0, 0.0 }
 0x396   :  { %1138 = vadd.xlane.f32.xlu0 %v1137_v1 }
 0x41f   :  { %v1139_v2 = vpop.xlane.xlu0 %1138 }
 0x420   :  { %1518 = vrcp.f32 %v1139_v2 }
 0x42d   :  { %v1519_v3 = vpop.eup %1518 }
 0x42e   :  { %v1141_v4 = vmul.f32 %v1519_v3, %v1517_v0 }
 0x430   :  { %1142 = vst.msk [vmem:[#allocation7] sm:$0xff] %vm1130_vm2, %v1141_v4 }
 0x431   :  { %1571 = shalt.err (!%p1568_p0)
}
 0x432   :  { %1152 = dma.vmem_to_hbm [thread:$0]  %s1150_s5, 128, %s1719_s7, [#allocation4]  }
 0x433   :  { %1584 = dma.done.wait [#allocation4], 128  }
 0x434   :  { %1585 = vsyncadd [#allocation4], 4294967168 }
 0x435   :  { %1156 = vsyncpa [#allocation3], 1 }
 0x436   :  { %1157 = vsyncpa [#allocation6], 1 }
 0x437   :  { %1158 = vsyncpa [#allocation4], 1 }

</bundles_post_ra>
